<compile_context>
chip_gen: v7x
topology: tpu7x:2x2x1
jax: 0.10.0
libtpu: 0.0.40
codegen_flags: <defaults>
</compile_context>

<pallas_src>
import functools
import math

import jax
import jax.numpy as jnp
from jax.experimental import pallas as pl
from jax.experimental.pallas import tpu as pltpu


# ----------------------------------------------------------------------------
# Parameter (buffer) construction -- deterministic, mirrors torch __init__.
# ----------------------------------------------------------------------------
def make_pos_enc(max_len: int, encoding_dim: int, dtype=jnp.float32) -> jnp.ndarray:
    """Builds the [max_len, encoding_dim] sinusoidal positional-encoding buffer."""
    if encoding_dim > 1 and encoding_dim % 2 != 0:
        raise ValueError("Encoding dim must be 1 or divisible by 2.")
    position = jnp.arange(0, max_len, dtype=jnp.float32)[:, None]            # [L, 1]
    div_term = jnp.exp(
        jnp.arange(0, encoding_dim, 2, dtype=jnp.float32)
        * (-math.log(max_len * 2) / encoding_dim)
    )                                                                         # [ceil(E/2)]
    pe = jnp.zeros((max_len, encoding_dim), dtype=jnp.float32)
    pe = pe.at[:, 0::2].set(jnp.sin(position * div_term))
    if encoding_dim > 1:
        pe = pe.at[:, 1::2].set(jnp.cos(position * div_term))
    return pe.astype(dtype)


# ----------------------------------------------------------------------------
# Pallas kernels
# ----------------------------------------------------------------------------
def _sum_kernel(x_ref, pe_ref, o_ref):
    # x_ref: (1, TS, D)  pe_ref: (TS, D)  o_ref: (1, TS, D)
    o_ref[...] = x_ref[...] + pe_ref[...][None, :, :]


def _cat_kernel(x_ref, pe_ref, o_ref, *, d):
    # x_ref: (1, TS, D)  pe_ref: (TS, E)  o_ref: (1, TS, D+E)
    # Two direct slice stores: no concatenate temporary / relayout copy.
    o_ref[:, :, :d] = x_ref[...]
    o_ref[:, :, d:] = pe_ref[...][None, :, :]


# ----------------------------------------------------------------------------
# Tiling heuristics
# ----------------------------------------------------------------------------
def _choose_block_rows(seq_len: int, out_dim: int, itemsize: int) -> int:
    """Pick a sequence-tile size: ~1 MiB output block, sublane-pack aligned."""
    sub = max(8, 32 // itemsize)              # 8 for f32, 16 for bf16, 32 for int8
    target_bytes = 1 << 20                    # ~1 MiB per output block
    rows = max(sub, target_bytes // max(1, out_dim * itemsize))
    if rows >= seq_len:
        return seq_len                        # full-extent block is always legal
    return max(sub, (rows // sub) * sub)


# ----------------------------------------------------------------------------
# Wrapper
# ----------------------------------------------------------------------------
def positional_encoding(
    x: jnp.ndarray,
    pos_enc: jnp.ndarray,
    encoding_type: str,
    *,
    block_rows: int | None = None,
) -> jnp.ndarray:
    """Applies positional encoding to x of shape [B, S, D]."""
    B, S, D = x.shape
    L, E = pos_enc.shape
    if S > L:
        raise ValueError(f"Sequence length {S} exceeds positional-encoding max_len {L}.")

    et = encoding_type.lower()
    if et == "sum":
        if E >= D:
            pe = pos_enc[:S, :D]              # matches pos_enc[:, :, :x.shape[2]]
        elif E == 1:
            # PyTorch broadcast semantics: [1, S, 1] + [B, S, D].
            pe = jnp.broadcast_to(pos_enc[:S, :], (S, D))
        else:
            raise ValueError(
                f"'sum' encoding requires encoding_dim >= input dim or == 1 ({E} vs {D})."
            )
        out_dim = D
        kernel = _sum_kernel
        flops = B * S * D                     # one VALU add per element
    elif et == "cat":
        pe = pos_enc[:S, :]
        out_dim = D + E
        kernel = functools.partial(_cat_kernel, d=D)
        flops = 0
    else:
        raise RuntimeError(f"Unrecognized positional encoding type: {encoding_type}")

    if pe.dtype != x.dtype:
        # Prefer building pos_enc in x.dtype once at init; this is the fallback.
        pe = pe.astype(x.dtype)

    itemsize = jnp.dtype(x.dtype).itemsize
    ts = block_rows if block_rows is not None else _choose_block_rows(S, out_dim, itemsize)
    ts = max(1, min(ts, S))
    pe_dim = pe.shape[-1]

    # Batch axis innermost so the pos_enc block index is constant across the
    # inner loop -> each pos_enc tile is DMA'd only once per sequence tile.
    grid = (pl.cdiv(S, ts), B)

    # Explicit VMEM budget: double-buffered x / out / pe tiles plus headroom,
    # clamped to stay well inside v7x's 64 MiB physical / 32 MiB scoped default.
    block_bytes = ts * (D + out_dim + pe_dim) * itemsize
    vmem_limit = int(min(max(4 * block_bytes + (4 << 20), 16 << 20), 32 << 20))

    # pos_enc is read once per sequence tile (not per batch) thanks to grid order.
    bytes_accessed = (x.size + pe.size + B * S * out_dim) * itemsize

    out = pl.pallas_call(
        kernel,
        out_shape=jax.ShapeDtypeStruct((B, S, out_dim), x.dtype),
        grid_spec=pltpu.PrefetchScalarGridSpec(
            num_scalar_prefetch=0,
            grid=grid,
            in_specs=[
                # x: one batch row, one sequence tile per step.
                pl.BlockSpec((1, ts, D), lambda s, b: (b, s, 0)),
                # pos_enc: same sequence tile, shared across batch (block index
                # unchanged over the inner batch loop -> no re-fetch).
                pl.BlockSpec((ts, pe_dim), lambda s, b: (s, 0)),
            ],
            out_specs=pl.BlockSpec((1, ts, out_dim), lambda s, b: (b, s, 0)),
        ),
        compiler_params=pltpu.CompilerParams(
            dimension_semantics=("parallel", "parallel"),
            vmem_limit_bytes=vmem_limit,
        ),
        cost_estimate=pl.CostEstimate(
            flops=flops, transcendentals=0, bytes_accessed=bytes_accessed
        ),
    )(x, pe)
    return out


# ----------------------------------------------------------------------------
# Reference (plain JAX) for verification
# ----------------------------------------------------------------------------
def positional_encoding_ref(x, pos_enc, encoding_type):
    B, S, D = x.shape
    pe = jnp.broadcast_to(pos_enc[None, :S, :], (B, S, pos_enc.shape[-1]))
    if encoding_type.lower() == "cat":
        return jnp.concatenate([x, pe.astype(x.dtype)], axis=-1)
    return x + pe[:, :, :D].astype(x.dtype)


if __name__ == "__main__":
    key = jax.random.PRNGKey(0)

    # Small shapes consistent with the forward: [batch, seq, input_dim]
    B, S, D = 2, 24, 32
    encoding_dim = 32
    max_len = 64

    x = jax.random.normal(key, (B, S, D), dtype=jnp.float32)
    # Build the buffer in the compute dtype once (no per-call astype).
    pos_enc = make_pos_enc(max_len, encoding_dim, dtype=x.dtype)

    # 'sum' mode, default (single S tile for this small S)
    out_sum = jax.block_until_ready(positional_encoding(x, pos_enc, "sum"))
    ref_sum = positional_encoding_ref(x, pos_enc, "sum")
    assert out_sum.shape == (B, S, D)
    assert jnp.allclose(out_sum, ref_sum, atol=1e-6), "sum mode mismatch"

    # 'sum' mode with an explicit small tile to exercise the (S-tiles, B) grid.
    out_sum_t = jax.block_until_ready(positional_encoding(x, pos_enc, "sum", block_rows=8))
    assert jnp.allclose(out_sum_t, ref_sum, atol=1e-6), "tiled sum mode mismatch"

    # 'cat' mode, default
    out_cat = jax.block_until_ready(positional_encoding(x, pos_enc, "cat"))
    ref_cat = positional_encoding_ref(x, pos_enc, "cat")
    assert out_cat.shape == (B, S, D + encoding_dim)
    assert jnp.allclose(out_cat, ref_cat, atol=1e-6), "cat mode mismatch"

    # 'cat' mode with an explicit small tile to exercise the tiled path.
    out_cat_t = jax.block_until_ready(positional_encoding(x, pos_enc, "cat", block_rows=8))
    assert jnp.allclose(out_cat_t, ref_cat, atol=1e-6), "tiled cat mode mismatch"

    # 'sum' mode with encoding_dim == 1 (PyTorch broadcast path).
    pos_enc_1 = make_pos_enc(max_len, 1, dtype=x.dtype)
    out_sum_b = jax.block_until_ready(positional_encoding(x, pos_enc_1, "sum"))
    ref_sum_b = positional_encoding_ref(x, pos_enc_1, "sum")
    assert jnp.allclose(out_sum_b, ref_sum_b, atol=1e-6), "broadcast sum mode mismatch"

    print("KERNEL_OK")
</pallas_src>

<mosaic_0001>
module attributes {stable_mosaic.version = 11 : i64} {
  func.func @_sum_kernel(%arg0: i32, %arg1: i32, %arg2: memref<1x24x32xf32, #tpu.memory_space<vmem>>, %arg3: memref<24x32xf32, #tpu.memory_space<vmem>>, %arg4: memref<1x24x32xf32, #tpu.memory_space<vmem>>) attributes {dimension_semantics = [#tpu.dimension_semantics<parallel>, #tpu.dimension_semantics<parallel>], iteration_bounds = array<i64: 1, 2>, scalar_prefetch = 0 : i64, scratch_operands = 0 : i64, tpu.core_type = #tpu.core_type<tc>, window_params = [{transform_indices = @transform_0, window_bounds = array<i64: 1, 24, 32>}, {transform_indices = @transform_1, window_bounds = array<i64: 24, 32>}, {transform_indices = @transform_2, window_bounds = array<i64: 1, 24, 32>}]} {
    %c0 = arith.constant 0 : index
    %c0_0 = arith.constant 0 : index
    %c0_1 = arith.constant 0 : index
    %0 = vector.load %arg2[%c0, %c0_0, %c0_1] : memref<1x24x32xf32, #tpu.memory_space<vmem>>, vector<1x24x32xf32>
    %c0_2 = arith.constant 0 : index
    %c0_3 = arith.constant 0 : index
    %1 = vector.load %arg3[%c0_2, %c0_3] : memref<24x32xf32, #tpu.memory_space<vmem>>, vector<24x32xf32>
    %2 = vector.shape_cast %1 : vector<24x32xf32> to vector<1x24x32xf32>
    %3 = arith.addf %0, %2 : vector<1x24x32xf32>
    %c0_4 = arith.constant 0 : index
    %c0_5 = arith.constant 0 : index
    %c0_6 = arith.constant 0 : index
    %4 = vector.load %arg4[%c0_4, %c0_5, %c0_6] : memref<1x24x32xf32, #tpu.memory_space<vmem>>, vector<1x24x32xf32>
    tpu.vector_store %arg4[%c0_4, %c0_5, %c0_6], %3 {strides = array<i32>} : memref<1x24x32xf32, #tpu.memory_space<vmem>>, vector<1x24x32xf32>,
    return
  }
  func.func @transform_0(%arg0: i32, %arg1: i32) -> (i32, i32, i32) {
    %c0_i32 = arith.constant 0 : i32
    %c0_i32_0 = arith.constant 0 : i32
    return %arg1, %arg0, %c0_i32 : i32, i32, i32
  }
  func.func @transform_1(%arg0: i32, %arg1: i32) -> (i32, i32) {
    %c0_i32 = arith.constant 0 : i32
    %c0_i32_0 = arith.constant 0 : i32
    return %arg0, %c0_i32 : i32, i32
  }
  func.func @transform_2(%arg0: i32, %arg1: i32) -> (i32, i32, i32) {
    %c0_i32 = arith.constant 0 : i32
    %c0_i32_0 = arith.constant 0 : i32
    return %arg1, %arg0, %c0_i32 : i32, i32, i32
  }
}

</mosaic_0001>

<bundles_post_ra>
// kernel: tpu_custom_call.1
= control target key start
LH: loop header
LB: loop body
LE: loop exit
PB: predicated region body
PF: predicated region fallthrough
CT: control target
= control target key end

     0   :  { %7 = vsyncpa [#allocation3], 0  ;;  %s813_s0 = inlined_call_operand.hbm [shape: f32[2,24,32], index: 0, kind: input, shape index: {}]   ;;  %s814_s1 = inlined_call_operand.hbm [shape: f32[24,32], index: 1, kind: input, shape index: {}]   ;;  %s815_s2 = inlined_call_operand.hbm [shape: f32[2,24,32], index: 2, kind: output, shape index: {}]  }
   0x1   :  { %9 = vsyncpa [#allocation3 + $0x1], 0 }
   0x2   :  { %10 = vsyncpa [#allocation6], 0 }
   0x3   :  { %11 = vsyncpa [#allocation4], 0 }
   0x4   :  { %13 = vsyncpa [#allocation4 + $0x1], 0  ;;  %s594_s9 = smov 0   ;;  %s596_s10 = smov 0  }
   0x5   :  { %s598_s11 = smov 0   ;;  %s600_s12 = smov 0  }
   0x6   :  { %s602_s13 = smov 0   ;;  %s604_s14 = smov 0  }
   0x7 LB: > { %s334_s15 = sadd.s32 4294967295, %s570_s14   ;;  %s335_s16 = sadd.s32 4294967294, %s570_s14   ;;  %s570_s14 = sphi %s604_s14, %s19_s14   ;;  %s566_s13 = sphi %s602_s13, %s838_s13   ;;  %s562_s12 = sphi %s600_s12, %s837_s12   ;;  %s558_s11 = sphi %s598_s11, %s836_s11   ;;  %s554_s10 = sphi %s596_s10, %s835_s10   ;;  %s550_s9 = sphi %s594_s9, %s834_s9  }
   0x8   : > { %p53_p0 = scmp.ne.s32.totalorder %s554_s10, %s550_s9  ;;  %p628_p1 = scmp.eq.s32.totalorder %s334_s15, 0 }
   0x9   : > { %p632_p2 = scmp.eq.s32.totalorder %s334_s15, 1  ;;  %p111_p3 = scmp.eq.s32.totalorder %s335_s16, 1 }
   0xa   : > { %s820_s17 = scalar_select %p628_p1, 1, 0 }
   0xb   : > { %s821_s18 = scalar_select %p632_p2, 1, 0 }
   0xc   : > { %p638_p4 = por %p628_p1, %p53_p0  ;;  %p336_p5 = scmp.ge.s32.totalorder %s570_s14, 1 }
   0xd   : > { %p643_p6 = por %p111_p3, %p53_p0  ;;  %p118_p7 = scmp.lt.s32.totalorder %s570_s14, 3 }
   0xe   : > { %s822_s19 = scalar_select %p638_p4, 1, 0 }
   0xf   : > { %s823_s20 = scalar_select %p643_p6, 1, 0 }
  0x10   : > { %p648_p8 = pnand %p336_p5, %p118_p7  ;;  %s572_s22 = smov [#allocation5]  }
  0x11   : > { %s133_s23 = sshll.u32 %s572_s22, 4  ;;  %s28_s25 = sadd.s32 1, %s566_s13  ;;  %s134_s23 = int_to_ptr.vmem [resolvable:$true] %s133_s23 }
  0x12   : > { %s824_s21 = scalar_select %p648_p8, 1, 0 }
  0x13   : > { %p357_p9 = pneg %p648_p8  ;;  %s426_s28 = scalar_lea.hbm %s814_s1, 384 }
  0x14   : > { %p427_p12 = scmp.ne.s32.totalorder %s814_s1, %s426_s28  ;;  %p433_p5 = scmp.lt.u32.totalorder %s426_s28, %s814_s1 }
  0x15   : > { %p657_p11 = pnand %p357_p9, %p628_p1 }
  0x17   : > { %p428_p13 = pneg %p657_p11 }
  0x19   : > { %p429_p0 = pnand %p428_p13, %p427_p12 }
  0x1b   : > { %p430_p3 = pneg %p429_p0 }
  0x1d   : > { %p435_p7 = pnand %p433_p5, %p430_p3 }
  0x1f   : > { %438 = shalt.err (!%p435_p7)
}
  0x20   : > { %s439_s5 = scalar_lea.vmem %s134_s23, 384  ;;  %p447_p1 = scmp.lt.s32.totalorder %s134_s23, %s134_s23 }
  0x21   : > { %p440_p9 = scmp.ne.s32.totalorder %s134_s23, %s439_s5  ;;  %p448_p4 = scmp.lt.s32.totalorder %s439_s5, %s439_s5 }
  0x23   : > { %p442_p10 = pnand %p440_p9, %p428_p13  ;;  %p449_p8 = por %p448_p4, %p447_p1 }
  0x25   : > { %p443_p6 = pneg %p442_p10 }
  0x27   : > { %p450_p2 = pnand %p449_p8, %p443_p6 }
  0x29   : > { %453 = shalt.err (!%p450_p2)
}
  0x2a   : > { %s573_s6 = smov 128   ;;  %s574_s7 = smov 8  }
  0x2b   : > { %360 = dma.hbm_to_vmem [thread:$0]  (!%p657_p11), %s814_s1, 384, %s134_s23, [#allocation6], %s573_s6, %s573_s6, %s574_s7  }
  0x2c   : > { %p29_p1 = scmp.ge.s32.totalorder %s28_s25, 2  ;;  %s40_s16 = sadd.s32 1, %s558_s11 }
  0x2d   : > { %p47_p2 = scmp.ne.s32.totalorder %s558_s11, %s554_s10  ;;  %p48_p4 = scmp.eq.s32.totalorder %s570_s14, 0 }
  0x2e   : > { %s840_s25 = smov (%p29_p1, %s28_s25), 0  ;;  %p826_p8 = scmp.ne.s32.totalorder %s821_s18, 0 }
  0x2f   : > { %p49_p6 = por %p48_p4, %p47_p2  ;;  %s35_s24 = ssub.s32 %s566_s13, %s840_s25 }
  0x30   : > { %p689_p10 = por %p826_p8, %p47_p2  ;;  %p370_p12 = scmp.lt.s32.totalorder %s570_s14, 2 }
  0x31   : > { %p38_p13 = scmp.eq.s32.totalorder %s35_s24, 0  ;;  %s147_s26 = sand.u32 1, %s558_s11  }
  0x32   : > { %s345_s27 = smul.u32 24, %s147_s26  ;;  %p701_p11 = pnand %p370_p12, %p49_p6 }
  0x33   : > { %s698_s28 = scalar_select %p38_p13, %s558_s11, %s40_s16  }
  0x34   : > { %s346_s23 = smul.u32 384, %s566_s13  ;;  %s151_s29 = scalar_lea.vmem [#allocation2], %s345_s27 }
  0x35   : > { %s160_s30 = sshll.u32 %s151_s29, 4  ;;  %s712_s8 = scalar_lea.sflag [#allocation3], %s147_s26  ;;  %s710_s30 = int_to_ptr.vmem [resolvable:$true] %s160_s30 }
  0x36   : > { %s708_s5 = scalar_lea.hbm %s813_s0, %s346_s23  ;;  %p456_p3 = pneg %p701_p11 }
  0x37   : > { %s454_s15 = scalar_lea.hbm %s708_s5, 384  ;;  %s459_s27 = scalar_lea.hbm %s813_s0, 768 }
  0x38   : > { %p455_p0 = scmp.ne.s32.totalorder %s708_s5, %s454_s15  ;;  %p460_p9 = scmp.lt.u32.totalorder %s708_s5, %s813_s0 }
  0x39   : > { %p461_p1 = scmp.lt.u32.totalorder %s459_s27, %s454_s15  ;;  %p463_p4 = scmp.lt.u32.totalorder %s454_s15, %s708_s5 }
  0x3a   : > { %p457_p5 = pnand %p456_p3, %p455_p0 }
  0x3b   : > { %p462_p2 = por %p461_p1, %p460_p9 }
  0x3c   : > { %p458_p7 = pneg %p457_p5 }
  0x3d   : > { %p464_p6 = por %p463_p4, %p462_p2 }
  0x3f   : > { %p465_p8 = pnand %p464_p6, %p458_p7 }
  0x41   : > { %468 = shalt.err (!%p465_p8)
}
  0x42   : > { %s469_s26 = scalar_lea.vmem %s710_s30, 384  ;;  %s575_s4 = smov [#allocation2]  }
  0x43   : > { %p470_p12 = scmp.ne.s32.totalorder %s710_s30, %s469_s26  ;;  %s474_s18 = sshll.u32 %s575_s4, 4  ;;  %s475_s18 = int_to_ptr.vmem [resolvable:$false] %s474_s18 }
  0x44   : > { %s476_s16 = scalar_lea.vmem %s475_s18, 768  ;;  %p477_p5 = scmp.lt.s32.totalorder %s710_s30, %s475_s18 }
  0x45   : > { %p472_p13 = pnand %p470_p12, %p456_p3  ;;  %p478_p9 = scmp.lt.s32.totalorder %s476_s16, %s469_s26 }
  0x47   : > { %p473_p0 = pneg %p472_p13  ;;  %p479_p1 = por %p478_p9, %p477_p5 }
  0x49   : > { %p480_p2 = pnand %p479_p1, %p473_p0 }
  0x4b   : > { %483 = shalt.err (!%p480_p2)
}
  0x4c   : > { %364 = dma.hbm_to_vmem [thread:$0]  (!%p701_p11), %s708_s5, 384, %s710_s30, %s712_s8, %s573_s6, %s573_s6, %s574_s7  }
  0x4d   : > { %p829_p3 = scmp.ne.s32.totalorder %s824_s21, 0 }
  0x4e   : > { %s746_s15 = sand.u32 (!%p829_p3), 1, %s554_s10   ;;  %p830_p7 = scmp.ne.s32.totalorder (!%p829_p3), %s822_s19, 0 }
  0x4f   : > { %172 = sbr.rel (%p829_p3) target bundleno = 116 (0x74), region = 28  ;;  %s175_s27 = scalar_lea.sflag (!%p829_p3), [#allocation3], %s746_s15 }
  0x50   : > { %s347_s24 = smul.u32 (!%p829_p3), 24, %s746_s15 }
  0x52   : > { %s178_s23 = scalar_lea.vmem (!%p829_p3), [#allocation2], %s347_s24 }
  0x56   : > { %537 = dma.done.wait (%p830_p7), %s175_s27, 384  }
  0x57   : > { %539 = vsyncadd (%p830_p7), %s175_s27, 4294966912  ;;  %p831_p4 = scmp.ne.s32.totalorder %s820_s17, 0 }
  0x59   : > { %541 = dma.done.wait (%p831_p4), [#allocation6], 384  }
  0x5a   : > { %543 = vsyncadd (%p831_p4), [#allocation6], 4294966912  ;;  %s202_s21 = scalar_lea.vmem [#allocation7], %s347_s24  ;;  %s348_s7 = smul.u32 384, %s562_s12  ;;  %v206_v0 = vld [vmem:[%s178_s23] sm:$0xff]  ;;  %v209_v1 = vld [vmem:[#allocation5] sm:$0xff] }
  0x5b   : > { %s235_s6 = sshll.u32 %s202_s21, 4  ;;  %vm215_vm0 = vcmask 261120   ;;  %v207_v2 = vld [vmem:[%s178_s23 + $0x8] sm:$0xff]  ;;  %v212_v3 = vadd.f32 %v209_v1, %v206_v0  ;;  %v210_v4 = vld [vmem:[#allocation5 + $0x8] sm:$0xff]  ;;  %v208_v5 = vld [vmem:[%s178_s23 + $0x10] sm:$0xff]  ;;  %s220_s30 = scalar_lea.sflag [#allocation4], %s746_s15  ;;  %s759_s6 = int_to_ptr.vmem [resolvable:$true] %s235_s6 }
  0x5c   : > { %v211_v6 = vld [vmem:[#allocation5 + $0x10] sm:$0xff]  ;;  %v213_v7 = vadd.f32 %v210_v4, %v207_v2  ;;  %s764_s12 = scalar_lea.hbm %s815_s2, %s348_s7  ;;  %s484_s3 = scalar_lea.vmem %s759_s6, 384 }
  0x5d   : > { %v214_v8 = vadd.f32 %v211_v6, %v208_v5  ;;  %216 = vst.msk [vmem:[%s202_s21] sm:$0xff] %vm215_vm0, %v212_v3  ;;  %p485_p11 = scmp.ne.s32.totalorder %s759_s6, %s484_s3  ;;  %s576_s5 = smov [#allocation7]  }
  0x5e   : > { %217 = vst.msk [vmem:[%s202_s21 + $0x8] sm:$0xff] %vm215_vm0, %v213_v7  ;;  %s488_s8 = sshll.u32 %s576_s5, 4  ;;  %s489_s8 = int_to_ptr.vmem [resolvable:$false] %s488_s8 }
  0x5f   : > { %218 = vst.msk [vmem:[%s202_s21 + $0x10] sm:$0xff] %vm215_vm0, %v214_v8  ;;  %p486_p6 = pnand %p485_p11, %p689_p10  ;;  %s490_s29 = scalar_lea.vmem %s489_s8, 768 }
  0x60   : > { %p491_p12 = scmp.lt.s32.totalorder %s759_s6, %s489_s8  ;;  %p492_p13 = scmp.lt.s32.totalorder %s490_s29, %s484_s3 }
  0x61   : > { %p487_p8 = pneg %p486_p6 }
  0x62   : > { %p493_p0 = por %p492_p13, %p491_p12 }
  0x64   : > { %p494_p5 = pnand %p493_p0, %p487_p8 }
  0x66   : > { %497 = shalt.err (!%p494_p5)
}
  0x67   : > { %s498_s26 = scalar_lea.hbm %s764_s12, 384  ;;  %s502_s16 = scalar_lea.hbm %s815_s2, 768 }
  0x68   : > { %p499_p9 = scmp.ne.s32.totalorder %s764_s12, %s498_s26  ;;  %p503_p3 = scmp.lt.u32.totalorder %s764_s12, %s815_s2 }
  0x69   : > { %p504_p7 = scmp.lt.u32.totalorder %s502_s16, %s498_s26  ;;  %p506_p11 = scmp.lt.u32.totalorder %s498_s26, %s764_s12 }
  0x6a   : > { %p500_p1 = pnand %p499_p9, %p689_p10 }
  0x6b   : > { %p505_p4 = por %p504_p7, %p503_p3 }
  0x6c   : > { %p501_p2 = pneg %p500_p1 }
  0x6d   : > { %p507_p6 = por %p506_p11, %p505_p4 }
  0x6f   : > { %p508_p8 = pnand %p507_p6, %p501_p2 }
  0x71   : > { %511 = shalt.err (!%p508_p8)
}
  0x72   : > { %s577_s23 = smov 128   ;;  %s578_s21 = smov 8  }
  0x73   : > { %355 = dma.vmem_to_hbm [thread:$0]  (%p689_p10), %s759_s6, 384, %s764_s12, %s220_s30, %s577_s23, %s577_s23, %s578_s21  }
  0x74 PF: > { %s250_s7 = sand.u32 1, %s550_s9   ;;  %p832_p12 = scmp.ne.s32.totalorder %s823_s20, 0 }
  0x75   : > { %p833_p13 = scmp.ge.s32.totalorder %s570_s14, 2  ;;  %s251_s17 = scalar_lea.sflag [#allocation4], %s250_s7 }
  0x77   : > { %p366_p0 = pnand %p833_p13, %p832_p12 }
  0x79   : > { %545 = dma.done.wait (!%p366_p0), %s251_s17, 384  }
  0x7a   : > { %547 = vsyncadd (!%p366_p0), %s251_s17, 4294966912  ;;  %s19_s14 = sadd.s32 1, %s570_s14   ;;  %s834_s9 = smov %s554_s10 }
  0x7b   : > { %p16_p5 = scmp.ge.s32.totalorder %s19_s14, 4   ;;  %s835_s10 = smov %s558_s11 }
  0x7c   : > { %s836_s11 = smov %s698_s28  ;;  %s837_s12 = smov %s566_s13 }
  0x7d   : > { %s838_s13 = smov %s840_s25  ;;  %18 = sbr.rel (!%p16_p5) target bundleno = 7 (0x7), region = 78 }
  0x84   :  { %256 = vsyncpa [#allocation3], 1 }
  0x85   :  { %258 = vsyncpa [#allocation3 + $0x1], 1 }
  0x86   :  { %259 = vsyncpa [#allocation6], 1 }
  0x87   :  { %260 = vsyncpa [#allocation4], 1 }
  0x88   :  { %262 = vsyncpa [#allocation4 + $0x1], 1 }

</bundles_post_ra>
